<compile_context>
chip_gen: v7x
topology: tpu7x:2x2x1
jax: 0.10.0
libtpu: 0.0.40
codegen_flags: <defaults>
</compile_context>

<pallas_src>
import jax
import jax.numpy as jnp
from jax.experimental import pallas as pl
from jax.experimental.pallas import tpu as pltpu

_LANE = 128


def _batch_transform_kernel(img_ref, out_ref):
    """make_transform(img, params) for one lane-dense block of images.

    img_ref / out_ref: VMEM tiles of shape (rows, feat_tile).
    """
    # TODO(synk): concrete subclasses insert real per-image transform math
    # here (with the shared params from get_transform_params carried via
    # scalar prefetch / SMEM); the base-class hooks are no-ops, so this
    # lowers to the identity copy.
    out_ref[...] = img_ref[...]


def _round_up(x: int, m: int) -> int:
    return ((x + m - 1) // m) * m


def base_batch_transform(
    imgs: jax.Array,
    *,
    skip_if_identity: bool = False,
    input_donated: bool = False,
) -> jax.Array:
    """BaseBatchTransform.forward for a stacked sequence imgs: [N, C, H, W].

    A single image [C, H, W] is also accepted (non-sequence branch of forward).
    """
    if skip_if_identity:
        # Base-class hooks are no-ops -> forward is exactly the identity.
        # Skipping the kernel removes both HBM streams entirely (the biggest
        # possible win); the kernel below remains as the subclass template.
        return imgs

    single = imgs.ndim == 3
    if single:
        imgs = imgs[None]  # non-sequence branch: treat as a batch of one.

    n, c, h, w = imgs.shape
    feat = c * h * w
    itemsize = jnp.dtype(imgs.dtype).itemsize

    # get_transform_params(imgs[0]) is a no-op hook in the base class -> no
    # params to prefetch; shared-params structure is trivially preserved.

    # --- Lane-dense layout -------------------------------------------------
    # Last dim = C*H*W, padded to a multiple of 128 so stores are unmasked
    # full-width vst and DMA descriptors are dense.
    flat = imgs.reshape(n, feat)
    feat_pad = _round_up(feat, _LANE)
    if feat_pad != feat:
        flat = jnp.pad(flat, ((0, 0), (0, feat_pad - feat)))

    # --- Block sizing ------------------------------------------------------
    # ~2 MiB per buffer: >=85% of HBM roofline per the measured tile-size
    # curve, and 4 live buffers (double-buffered in + out) + headroom stays
    # well inside v5e's 16 MiB default scoped VMEM and v7x's 64 MiB physical.
    target_block_bytes = 2 << 20

    # dtype-aware sublane granularity: 8 rows f32, 16 bf16, 32 int8/fp8.
    sub = max(8, 32 // itemsize)

    # Feature tile: full feature dim if it fits; otherwise a multiple of 128
    # sized so that `sub` rows of it stay within the block budget.
    max_feat_elems = max(_LANE, (target_block_bytes // (sub * itemsize)) // _LANE * _LANE)
    feat_tile = min(feat_pad, max_feat_elems)

    # Row tile: as many images/rows as fit in the budget.
    row_tile_bytes = feat_tile * itemsize
    rows = min(n, max(sub, target_block_bytes // max(1, row_tile_bytes)))

    # v7x megacore: guarantee >= 4 row steps once the batch is big enough that
    # splitting across the two TensorCores (and overlapping fetch/writeback)
    # matters; neutral on single-core v5e/v6e.
    total_bytes = n * feat_pad * itemsize
    if total_bytes > (16 << 20):
        rows = min(rows, max(sub, (pl.cdiv(n, 4) // sub) * sub))

    # Keep the sublane dim densely packed when not taking the full batch.
    if rows < n:
        rows = max(sub, (rows // sub) * sub)

    grid = (pl.cdiv(n, rows), pl.cdiv(feat_pad, feat_tile))
    block_bytes = rows * feat_tile * itemsize
    # Explicit scoped-VMEM limit: 2x double-buffered blocks + Mosaic scratch
    # headroom.  One code path for v5e / v6e / v7x regardless of their
    # different default scoped limits.
    vmem_limit_bytes = int(max(12 << 20, 4 * block_bytes + (4 << 20)))

    # Aliasing only helps when the caller actually donates `imgs`; otherwise
    # XLA inserts a defensive copy (an *extra* HBM stream).  Note aliasing
    # does NOT remove the pipelined output write -- the kernel is always a
    # full HBM read + write.
    io_aliases = {0: 0} if input_donated else {}

    out_flat = pl.pallas_call(
        _batch_transform_kernel,
        out_shape=jax.ShapeDtypeStruct((n, feat_pad), flat.dtype),
        grid=grid,
        in_specs=[pl.BlockSpec((rows, feat_tile), lambda i, j: (i, j))],
        out_specs=pl.BlockSpec((rows, feat_tile), lambda i, j: (i, j)),
        input_output_aliases=io_aliases,
        compiler_params=pltpu.CompilerParams(
            # All blocks independent (per-image, per-feature-chunk): lets v7x
            # shard grid steps across both TensorCores.
            dimension_semantics=("parallel", "parallel"),
            vmem_limit_bytes=vmem_limit_bytes,
        ),
    )(flat)

    if feat_pad != feat:
        out_flat = out_flat[:, :feat]
    out = out_flat.reshape(n, c, h, w)
    return out[0] if single else out


if __name__ == "__main__":
    key = jax.random.PRNGKey(0)

    # Sequence of 2 images, each C=4, H=16, W=16 (NCHW), stacked on axis 0.
    imgs = jax.random.normal(key, (2, 4, 16, 16), dtype=jnp.float32)
    out = jax.block_until_ready(base_batch_transform(imgs))
    assert out.shape == imgs.shape and out.dtype == imgs.dtype
    assert bool(jnp.all(out == imgs))

    # Non-multiple-of-128 feature dim (exercises the lane-padding path) and a
    # bigger batch (exercises row tiling with a partial tail block).
    imgs2 = jax.random.normal(key, (10, 3, 10, 10), dtype=jnp.float32)
    out2 = jax.block_until_ready(base_batch_transform(imgs2))
    assert out2.shape == imgs2.shape and bool(jnp.all(out2 == imgs2))

    # Identity short-circuit path (the true base-class fast path).
    out3 = base_batch_transform(imgs, skip_if_identity=True)
    assert out3 is imgs

    print("KERNEL_OK")
</pallas_src>

<mosaic_0001>
module attributes {stable_mosaic.version = 11 : i64} {
  func.func @_batch_transform_kernel(%arg0: i32, %arg1: i32, %arg2: memref<2x1024xf32, #tpu.memory_space<vmem>>, %arg3: memref<2x1024xf32, #tpu.memory_space<vmem>>) attributes {dimension_semantics = [#tpu.dimension_semantics<parallel>, #tpu.dimension_semantics<parallel>], iteration_bounds = array<i64: 1, 1>, scalar_prefetch = 0 : i64, scratch_operands = 0 : i64, tpu.core_type = #tpu.core_type<tc>, window_params = [{transform_indices = @transform_0, window_bounds = array<i64: 2, 1024>}, {transform_indices = @transform_1, window_bounds = array<i64: 2, 1024>}]} {
    %c0 = arith.constant 0 : index
    %c0_0 = arith.constant 0 : index
    %0 = vector.load %arg2[%c0, %c0_0] : memref<2x1024xf32, #tpu.memory_space<vmem>>, vector<2x1024xf32>
    %c0_1 = arith.constant 0 : index
    %c0_2 = arith.constant 0 : index
    %1 = vector.load %arg3[%c0_1, %c0_2] : memref<2x1024xf32, #tpu.memory_space<vmem>>, vector<2x1024xf32>
    tpu.vector_store %arg3[%c0_1, %c0_2], %0 {strides = array<i32>} : memref<2x1024xf32, #tpu.memory_space<vmem>>, vector<2x1024xf32>,
    return
  }
  func.func @transform_0(%arg0: i32, %arg1: i32) -> (i32, i32) {
    %c0_i32 = arith.constant 0 : i32
    return %arg0, %arg1 : i32, i32
  }
  func.func @transform_1(%arg0: i32, %arg1: i32) -> (i32, i32) {
    %c0_i32 = arith.constant 0 : i32
    return %arg0, %arg1 : i32, i32
  }
}

</mosaic_0001>

<bundles_post_ra>
// kernel: tpu_custom_call.1
= control target key start
LH: loop header
LB: loop body
LE: loop exit
PB: predicated region body
PF: predicated region fallthrough
CT: control target
= control target key end

     0   :  { %6 = vsyncpa [#allocation3], 0  ;;  %s126_s0 = inlined_call_operand.hbm [shape: f32[2,1024], index: 0, kind: input, shape index: {}]   ;;  %s127_s1 = inlined_call_operand.hbm [shape: f32[2,1024], index: 1, kind: output, shape index: {}]  }
   0x1   :  { %7 = vsyncpa [#allocation4], 0  ;;  %s90_s6 = smov [#allocation2]   ;;  %s42_s10 = scalar_lea.hbm %s126_s0, 256 }
   0x2   :  { %s14_s7 = sshll.u32 %s90_s6, 4  ;;  %p43_p0 = scmp.ne.s32.totalorder %s126_s0, %s42_s10  ;;  %s15_s7 = int_to_ptr.vmem [resolvable:$true] %s14_s7 }
   0x3   :  { %p46_p1 = scmp.lt.u32.totalorder %s42_s10, %s126_s0 }
   0x5   :  { %p48_p2 = pnand %p46_p1, %p43_p0 }
   0x7   :  { %51 = shalt.err (!%p48_p2)
}
   0x8   :  { %s52_s15 = scalar_lea.vmem %s15_s7, 256  ;;  %p57_p4 = scmp.lt.s32.totalorder %s15_s7, %s15_s7 }
   0x9   :  { %p53_p3 = scmp.ne.s32.totalorder %s15_s7, %s52_s15  ;;  %p58_p5 = scmp.lt.s32.totalorder %s52_s15, %s52_s15 }
   0xb   :  { %p59_p6 = por %p58_p5, %p57_p4 }
   0xd   :  { %p60_p7 = pnand %p59_p6, %p53_p3 }
   0xf   :  { %63 = shalt.err (!%p60_p7)
}
  0x10   :  { %17 = dma.hbm_to_vmem [thread:$0]  %s126_s0, 256, %s15_s7, [#allocation3]  }
  0x11   :  { %86 = dma.done.wait [#allocation3], 256  }
  0x12   :  { %87 = vsyncadd [#allocation3], 4294967040  ;;  %s91_s18 = smov [#allocation5]   ;;  %v21_v0 = vld [vmem:[#allocation2] sm:$0xff]  ;;  %v22_v1 = vld [vmem:[#allocation2 + $0x8] sm:$0xff] }
  0x13   :  { %s31_s19 = sshll.u32 %s91_s18, 4  ;;  %23 = vst [vmem:[#allocation5] sm:$0xff] %v21_v0  ;;  %24 = vst [vmem:[#allocation5 + $0x8] sm:$0xff] %v22_v1  ;;  %s32_s19 = int_to_ptr.vmem [resolvable:$true] %s31_s19 }
  0x14   :  { %s64_s20 = scalar_lea.vmem %s32_s19, 256  ;;  %p69_p9 = scmp.lt.s32.totalorder %s32_s19, %s32_s19 }
  0x15   :  { %p65_p8 = scmp.ne.s32.totalorder %s32_s19, %s64_s20  ;;  %p70_p10 = scmp.lt.s32.totalorder %s64_s20, %s64_s20 }
  0x17   :  { %p71_p11 = por %p70_p10, %p69_p9 }
  0x19   :  { %p72_p12 = pnand %p71_p11, %p65_p8 }
  0x1b   :  { %75 = shalt.err (!%p72_p12)
}
  0x1c   :  { %s76_s0 = scalar_lea.hbm %s127_s1, 256 }
  0x1d   :  { %p77_p13 = scmp.ne.s32.totalorder %s127_s1, %s76_s0  ;;  %p80_p0 = scmp.lt.u32.totalorder %s76_s0, %s127_s1 }
  0x1f   :  { %p82_p1 = pnand %p80_p0, %p77_p13 }
  0x21   :  { %85 = shalt.err (!%p82_p1)
}
  0x22   :  { %34 = dma.vmem_to_hbm [thread:$0]  %s32_s19, 256, %s127_s1, [#allocation4]  }
  0x23   :  { %88 = dma.done.wait [#allocation4], 256  }
  0x24   :  { %89 = vsyncadd [#allocation4], 4294967040 }
  0x25   :  { %38 = vsyncpa [#allocation3], 1 }
  0x26   :  { %39 = vsyncpa [#allocation4], 1 }

</bundles_post_ra>
